<compile_context>
chip_gen: v7x
topology: tpu7x:2x2x1
jax: 0.10.0
libtpu: 0.0.40
codegen_flags: <defaults>
</compile_context>

<pallas_src>
import jax
import jax.numpy as jnp
from jax.experimental import pallas as pl
from jax.experimental.pallas import tpu as pltpu


def _lipswish(x):
    return 0.909 * x * jax.nn.sigmoid(x)


# ----------------------------- Pallas kernel --------------------------------

def _make_ffnn_kernel(num_linear: int):
    """Kernel for the full FFNN with the t/concat glue fused in.

    refs layout: (t_ref[SMEM], h_ref, w0_h, w0_t, b0, w1, b1, ..., out_ref)
    First layer: x = h @ w0_h + t * w0_t + b0  (== concat([t, h]) @ W0 + b0).
    Hidden layers use lipswish(x) = 0.909 * x * sigmoid(x); final layer uses tanh.
    Weights are bf16 (MXU), accumulation / bias-add / activations are f32.
    """

    def kernel(t_ref, h_ref, *rest):
        out_ref = rest[-1]
        params = rest[:-1]

        # Round t through bf16 so it matches a bf16 cast of concat([t, h]).
        t = t_ref[0].astype(jnp.bfloat16).astype(jnp.float32)

        w0_h = params[0][...]                       # (hidden, mlp)  bf16
        w0_t = params[1][...].astype(jnp.float32)   # (1, mlp)
        b0 = params[2][...]                         # (1, mlp)       f32

        x = jnp.dot(h_ref[...].astype(jnp.bfloat16), w0_h,
                    preferred_element_type=jnp.float32)
        x = x + t * w0_t + b0

        if num_linear == 1:
            x = jnp.tanh(x)
        else:
            x = _lipswish(x)
            for i in range(1, num_linear):
                w = params[3 + 2 * (i - 1)][...]          # bf16
                b = params[3 + 2 * (i - 1) + 1][...]      # f32
                x = jnp.dot(x.astype(jnp.bfloat16), w,
                            preferred_element_type=jnp.float32) + b
                if i < num_linear - 1:
                    x = _lipswish(x)
                else:
                    x = jnp.tanh(x)

        out_ref[...] = x.astype(out_ref.dtype)

    return kernel


def ffnn_pallas(t_arr, h, params, num_linear, out_width, *, batch_tile=128):
    """Run the FFNN on (B, hidden) state `h` with scalar time `t_arr` (shape (1,))."""
    B, hidden = h.shape
    tb = min(batch_tile, B)           # keep tile <= 128 to stay spill-free in vregs
    grid = (pl.cdiv(B, tb),)

    in_specs = [
        pl.BlockSpec(memory_space=pltpu.MemorySpace.SMEM),   # t scalar -> SMEM
        pl.BlockSpec((tb, hidden), lambda i: (i, 0)),        # h batch tile
    ]
    # Weights/biases: full block, same block index for every batch tile -> VMEM-resident.
    for p in params:
        in_specs.append(pl.BlockSpec(p.shape, lambda i: (0, 0)))

    return pl.pallas_call(
        _make_ffnn_kernel(num_linear),
        out_shape=jax.ShapeDtypeStruct((B, out_width), jnp.float32),
        grid=grid,
        in_specs=in_specs,
        out_specs=pl.BlockSpec((tb, out_width), lambda i: (i, 0)),
        compiler_params=pltpu.CompilerParams(
            dimension_semantics=("parallel",),
            vmem_limit_bytes=8 << 20,
        ),
    )(t_arr, h, *params)


# --------------------------- Module-level wrapper ----------------------------

class DiscriminatorFuncPallas:
    """JAX/Pallas port of DiscriminatorFunc."""

    def __init__(self, data_size, hidden_size, mlp_size, num_layers, key):
        self._data_size = data_size
        self._hidden_size = hidden_size

        in_size = 1 + hidden_size
        out_size = hidden_size * (1 + data_size)
        self._out_size = out_size
        # Pad final layer output width to a multiple of 128 for lane-dense stores.
        self._out_padded = out_size + ((-out_size) % 128)

        # FFNN: Linear(in, mlp) + lipswish, (num_layers-1) x [Linear(mlp, mlp) + lipswish],
        #       Linear(mlp, out) + tanh
        dims = [in_size] + [mlp_size] * num_layers + [out_size]

        ws, bs = [], []
        for i in range(len(dims) - 1):
            fan_in, fan_out = dims[i], dims[i + 1]
            key, wk, bk = jax.random.split(key, 3)
            bound = 1.0 / (fan_in ** 0.5)
            # PyTorch Linear default init (uniform +/- 1/sqrt(fan_in)), deterministic here.
            w = jax.random.uniform(wk, (fan_in, fan_out), jnp.float32, -bound, bound)
            b = jax.random.uniform(bk, (1, fan_out), jnp.float32, -bound, bound)
            ws.append(w)
            bs.append(b)

        # Zero-pad the last layer's output width (extra cols produce tanh(0)=0, sliced off).
        pad = self._out_padded - out_size
        if pad:
            ws[-1] = jnp.pad(ws[-1], ((0, 0), (0, pad)))
            bs[-1] = jnp.pad(bs[-1], ((0, 0), (0, pad)))

        # Split first layer so the kernel can fuse concat([t, h]) @ W0:
        #   x = h @ W0[1:] + t * W0[0:1] + b0
        self.w0_h = ws[0][1:].astype(jnp.bfloat16)    # (hidden, mlp)
        self.w0_t = ws[0][0:1].astype(jnp.bfloat16)   # (1, mlp)
        self.b0 = bs[0]                               # (1, mlp) f32
        self.rest_weights = [w.astype(jnp.bfloat16) for w in ws[1:]]
        self.rest_biases = [b for b in bs[1:]]        # f32
        self._num_linear = len(ws)

    def _params(self):
        params = [self.w0_h, self.w0_t, self.b0]
        for w, b in zip(self.rest_weights, self.rest_biases):
            params += [w, b]
        return params

    def __call__(self, t, h):
        # TODO(synk): when used inside an SDE/CDE solver, amortize the per-step launch by
        # moving several solver steps inside one pallas_call (weights stay VMEM-resident).
        B = h.shape[0]
        t_arr = jnp.asarray(t, jnp.float32).reshape(1)
        y = ffnn_pallas(t_arr, h.astype(jnp.float32), self._params(),
                        self._num_linear, self._out_padded)
        y = y[:, :self._out_size]
        # TODO(synk): reference forward's .view(B, hidden, data_size) is inconsistent with
        # __init__'s out_size = hidden*(1+data_size); using (B, hidden, 1+data_size)
        # (as in the original torchsde SDE-GAN example) so the reshape is valid.
        return y.reshape(B, self._hidden_size, 1 + self._data_size)

    # Pure-JAX reference (same bf16 weights / f32 accumulation) for correctness checking.
    def reference(self, t, h):
        B = h.shape[0]
        t_col = jnp.broadcast_to(jnp.asarray(t, jnp.float32).reshape(1, 1), (B, 1))
        x = jnp.concatenate([t_col, h.astype(jnp.float32)], axis=1)
        w0_full = jnp.concatenate([self.w0_t, self.w0_h], axis=0)
        weights = [w0_full] + list(self.rest_weights)
        biases = [self.b0] + list(self.rest_biases)
        n = len(weights)
        for i, (w, b) in enumerate(zip(weights, biases)):
            x = jnp.dot(x.astype(jnp.bfloat16), w,
                        preferred_element_type=jnp.float32) + b
            if i < n - 1:
                x = _lipswish(x)
            else:
                x = jnp.tanh(x)
        x = x[:, :self._out_size]
        return x.reshape(B, self._hidden_size, 1 + self._data_size)


# ----------------------------------- main ------------------------------------

if __name__ == "__main__":
    key = jax.random.PRNGKey(0)
    key, hkey, pkey = jax.random.split(key, 3)

    batch = 2
    data_size = 4
    hidden_size = 32
    mlp_size = 32
    num_layers = 2

    module = DiscriminatorFuncPallas(
        data_size=data_size,
        hidden_size=hidden_size,
        mlp_size=mlp_size,
        num_layers=num_layers,
        key=pkey,
    )

    t = jnp.float32(0.5)
    h = jax.random.normal(hkey, (batch, hidden_size), jnp.float32)

    out = jax.block_until_ready(module(t, h))
    ref = jax.block_until_ready(module.reference(t, h))

    assert out.shape == (batch, hidden_size, 1 + data_size), out.shape
    assert jnp.allclose(out, ref, atol=2e-5, rtol=1e-5), "mismatch vs JAX reference"

    print("KERNEL_OK")
</pallas_src>

<mosaic_0001>
module attributes {stable_mosaic.version = 11 : i64} {
  func.func @kernel(%arg0: i32, %arg1: memref<1xf32, #tpu.memory_space<smem>>, %arg2: memref<2x32xf32, #tpu.memory_space<vmem>>, %arg3: memref<32x32xbf16, #tpu.memory_space<vmem>>, %arg4: memref<1x32xbf16, #tpu.memory_space<vmem>>, %arg5: memref<1x32xf32, #tpu.memory_space<vmem>>, %arg6: memref<32x32xbf16, #tpu.memory_space<vmem>>, %arg7: memref<1x32xf32, #tpu.memory_space<vmem>>, %arg8: memref<32x256xbf16, #tpu.memory_space<vmem>>, %arg9: memref<1x256xf32, #tpu.memory_space<vmem>>, %arg10: memref<2x256xf32, #tpu.memory_space<vmem>>) attributes {dimension_semantics = [#tpu.dimension_semantics<parallel>], iteration_bounds = array<i64: 1>, scalar_prefetch = 0 : i64, scratch_operands = 0 : i64, tpu.core_type = #tpu.core_type<tc>, window_params = [{transform_indices = @transform_0, window_bounds = array<i64: 1>}, {transform_indices = @transform_1, window_bounds = array<i64: 2, 32>}, {pipeline_mode = #tpu.pipeline_mode<synchronous>, transform_indices = @transform_2, window_bounds = array<i64: 32, 32>}, {pipeline_mode = #tpu.pipeline_mode<synchronous>, transform_indices = @transform_3, window_bounds = array<i64: 1, 32>}, {pipeline_mode = #tpu.pipeline_mode<synchronous>, transform_indices = @transform_4, window_bounds = array<i64: 1, 32>}, {pipeline_mode = #tpu.pipeline_mode<synchronous>, transform_indices = @transform_5, window_bounds = array<i64: 32, 32>}, {pipeline_mode = #tpu.pipeline_mode<synchronous>, transform_indices = @transform_6, window_bounds = array<i64: 1, 32>}, {pipeline_mode = #tpu.pipeline_mode<synchronous>, transform_indices = @transform_7, window_bounds = array<i64: 32, 256>}, {pipeline_mode = #tpu.pipeline_mode<synchronous>, transform_indices = @transform_8, window_bounds = array<i64: 1, 256>}, {transform_indices = @transform_9, window_bounds = array<i64: 2, 256>}]} {
    %c0 = arith.constant 0 : index
    %0 = memref.load %arg1[%c0] : memref<1xf32, #tpu.memory_space<smem>>
    %1 = arith.truncf %0 : f32 to bf16
    %2 = arith.extf %1 : bf16 to f32
    %c0_0 = arith.constant 0 : index
    %c0_1 = arith.constant 0 : index
    %3 = vector.load %arg3[%c0_0, %c0_1] : memref<32x32xbf16, #tpu.memory_space<vmem>>, vector<32x32xbf16>
    %c0_2 = arith.constant 0 : index
    %c0_3 = arith.constant 0 : index
    %4 = vector.load %arg4[%c0_2, %c0_3] : memref<1x32xbf16, #tpu.memory_space<vmem>>, vector<1x32xbf16>
    %5 = arith.extf %4 : vector<1x32xbf16> to vector<1x32xf32>
    %c0_4 = arith.constant 0 : index
    %c0_5 = arith.constant 0 : index
    %6 = vector.load %arg5[%c0_4, %c0_5] : memref<1x32xf32, #tpu.memory_space<vmem>>, vector<1x32xf32>
    %c0_6 = arith.constant 0 : index
    %c0_7 = arith.constant 0 : index
    %7 = vector.load %arg2[%c0_6, %c0_7] : memref<2x32xf32, #tpu.memory_space<vmem>>, vector<2x32xf32>
    %8 = arith.truncf %7 : vector<2x32xf32> to vector<2x32xbf16>
    %cst = arith.constant dense<0.000000e+00> : vector<2x32xf32>
    %9 = tpu.matmul %8, %3, %cst {dimension_numbers = #tpu.dot_dimension_numbers<[1], [0], [0], [1], [0, 0, 1, 1], [], []>} : vector<2x32xbf16>, vector<32x32xbf16>, vector<2x32xf32> -> vector<2x32xf32>
    %10 = vector.broadcast %2 : f32 to vector<1x32xf32>
    %11 = arith.mulf %10, %5 : vector<1x32xf32>
    %12 = vector.broadcast %11 : vector<1x32xf32> to vector<2x32xf32>
    %13 = arith.addf %9, %12 : vector<2x32xf32>
    %14 = vector.broadcast %6 : vector<1x32xf32> to vector<2x32xf32>
    %15 = arith.addf %13, %14 : vector<2x32xf32>
    %cst_8 = arith.constant 0.908999979 : f32
    %16 = vector.broadcast %cst_8 : f32 to vector<2x32xf32>
    %17 = arith.mulf %16, %15 : vector<2x32xf32>
    %18 = arith.negf %15 : vector<2x32xf32>
    %19 = math.exp %18 : vector<2x32xf32>
    %cst_9 = arith.constant 1.000000e+00 : f32
    %20 = vector.broadcast %cst_9 : f32 to vector<2x32xf32>
    %21 = arith.addf %20, %19 : vector<2x32xf32>
    %22 = arith.divf %20, %21 : vector<2x32xf32>
    %23 = arith.mulf %17, %22 : vector<2x32xf32>
    %c0_10 = arith.constant 0 : index
    %c0_11 = arith.constant 0 : index
    %24 = vector.load %arg6[%c0_10, %c0_11] : memref<32x32xbf16, #tpu.memory_space<vmem>>, vector<32x32xbf16>
    %c0_12 = arith.constant 0 : index
    %c0_13 = arith.constant 0 : index
    %25 = vector.load %arg7[%c0_12, %c0_13] : memref<1x32xf32, #tpu.memory_space<vmem>>, vector<1x32xf32>
    %26 = arith.truncf %23 : vector<2x32xf32> to vector<2x32xbf16>
    %cst_14 = arith.constant dense<0.000000e+00> : vector<2x32xf32>
    %27 = tpu.matmul %26, %24, %cst_14 {dimension_numbers = #tpu.dot_dimension_numbers<[1], [0], [0], [1], [0, 0, 1, 1], [], []>} : vector<2x32xbf16>, vector<32x32xbf16>, vector<2x32xf32> -> vector<2x32xf32>
    %28 = vector.broadcast %25 : vector<1x32xf32> to vector<2x32xf32>
    %29 = arith.addf %27, %28 : vector<2x32xf32>
    %cst_15 = arith.constant 0.908999979 : f32
    %30 = vector.broadcast %cst_15 : f32 to vector<2x32xf32>
    %31 = arith.mulf %30, %29 : vector<2x32xf32>
    %32 = arith.negf %29 : vector<2x32xf32>
    %33 = math.exp %32 : vector<2x32xf32>
    %cst_16 = arith.constant 1.000000e+00 : f32
    %34 = vector.broadcast %cst_16 : f32 to vector<2x32xf32>
    %35 = arith.addf %34, %33 : vector<2x32xf32>
    %36 = arith.divf %34, %35 : vector<2x32xf32>
    %37 = arith.mulf %31, %36 : vector<2x32xf32>
    %c0_17 = arith.constant 0 : index
    %c0_18 = arith.constant 0 : index
    %38 = vector.load %arg8[%c0_17, %c0_18] : memref<32x256xbf16, #tpu.memory_space<vmem>>, vector<32x256xbf16>
    %c0_19 = arith.constant 0 : index
    %c0_20 = arith.constant 0 : index
    %39 = vector.load %arg9[%c0_19, %c0_20] : memref<1x256xf32, #tpu.memory_space<vmem>>, vector<1x256xf32>
    %40 = arith.truncf %37 : vector<2x32xf32> to vector<2x32xbf16>
    %cst_21 = arith.constant dense<0.000000e+00> : vector<2x256xf32>
    %41 = tpu.matmul %40, %38, %cst_21 {dimension_numbers = #tpu.dot_dimension_numbers<[1], [0], [0], [1], [0, 0, 1, 1], [], []>} : vector<2x32xbf16>, vector<32x256xbf16>, vector<2x256xf32> -> vector<2x256xf32>
    %42 = vector.broadcast %39 : vector<1x256xf32> to vector<2x256xf32>
    %43 = arith.addf %41, %42 : vector<2x256xf32>
    %44 = math.tanh %43 : vector<2x256xf32>
    %c0_22 = arith.constant 0 : index
    %c0_23 = arith.constant 0 : index
    %45 = vector.load %arg10[%c0_22, %c0_23] : memref<2x256xf32, #tpu.memory_space<vmem>>, vector<2x256xf32>
    tpu.vector_store %arg10[%c0_22, %c0_23], %44 {strides = array<i32>} : memref<2x256xf32, #tpu.memory_space<vmem>>, vector<2x256xf32>,
    return
  }
  func.func @transform_0(%arg0: i32) -> i32 {
    %c0_i32 = arith.constant 0 : i32
    %c0_i32_0 = arith.constant 0 : i32
    return %c0_i32 : i32
  }
  func.func @transform_1(%arg0: i32) -> (i32, i32) {
    %c0_i32 = arith.constant 0 : i32
    %c0_i32_0 = arith.constant 0 : i32
    return %arg0, %c0_i32 : i32, i32
  }
  func.func @transform_2(%arg0: i32) -> (i32, i32) {
    %c0_i32 = arith.constant 0 : i32
    %c0_i32_0 = arith.constant 0 : i32
    %c0_i32_1 = arith.constant 0 : i32
    return %c0_i32, %c0_i32_0 : i32, i32
  }
  func.func @transform_3(%arg0: i32) -> (i32, i32) {
    %c0_i32 = arith.constant 0 : i32
    %c0_i32_0 = arith.constant 0 : i32
    %c0_i32_1 = arith.constant 0 : i32
    return %c0_i32, %c0_i32_0 : i32, i32
  }
  func.func @transform_4(%arg0: i32) -> (i32, i32) {
    %c0_i32 = arith.constant 0 : i32
    %c0_i32_0 = arith.constant 0 : i32
    %c0_i32_1 = arith.constant 0 : i32
    return %c0_i32, %c0_i32_0 : i32, i32
  }
  func.func @transform_5(%arg0: i32) -> (i32, i32) {
    %c0_i32 = arith.constant 0 : i32
    %c0_i32_0 = arith.constant 0 : i32
    %c0_i32_1 = arith.constant 0 : i32
    return %c0_i32, %c0_i32_0 : i32, i32
  }
  func.func @transform_6(%arg0: i32) -> (i32, i32) {
    %c0_i32 = arith.constant 0 : i32
    %c0_i32_0 = arith.constant 0 : i32
    %c0_i32_1 = arith.constant 0 : i32
    return %c0_i32, %c0_i32_0 : i32, i32
  }
  func.func @transform_7(%arg0: i32) -> (i32, i32) {
    %c0_i32 = arith.constant 0 : i32
    %c0_i32_0 = arith.constant 0 : i32
    %c0_i32_1 = arith.constant 0 : i32
    return %c0_i32, %c0_i32_0 : i32, i32
  }
  func.func @transform_8(%arg0: i32) -> (i32, i32) {
    %c0_i32 = arith.constant 0 : i32
    %c0_i32_0 = arith.constant 0 : i32
    %c0_i32_1 = arith.constant 0 : i32
    return %c0_i32, %c0_i32_0 : i32, i32
  }
  func.func @transform_9(%arg0: i32) -> (i32, i32) {
    %c0_i32 = arith.constant 0 : i32
    %c0_i32_0 = arith.constant 0 : i32
    return %arg0, %c0_i32 : i32, i32
  }
}

</mosaic_0001>

<bundles_post_ra>
// kernel: tpu_custom_call.1
= control target key start
LH: loop header
LB: loop body
LE: loop exit
PB: predicated region body
PF: predicated region fallthrough
CT: control target
= control target key end

     0   :  { %15 = vsyncpa [#allocation4], 0  ;;  %s740_s0 = inlined_call_operand.<no memory space> [shape: f32[1], index: 0, kind: input, shape index: {}]   ;;  %s741_s1 = inlined_call_operand.vmem [shape: f32[2,32], index: 1, kind: input, shape index: {}]   ;;  %s742_s2 = inlined_call_operand.hbm [shape: bf16[32,32], index: 2, kind: input, shape index: {}]   ;;  %s743_s3 = inlined_call_operand.hbm [shape: bf16[1,32], index: 3, kind: input, shape index: {}]   ;;  %s744_s4 = inlined_call_operand.hbm [shape: f32[1,32], index: 4, kind: input, shape index: {}]   ;;  %s745_s5 = inlined_call_operand.vmem [shape: bf16[32,32], index: 5, kind: input, shape index: {}]   ;;  %s746_s6 = inlined_call_operand.vmem [shape: f32[1,32], index: 6, kind: input, shape index: {}]   ;;  %s747_s7 = inlined_call_operand.hbm [shape: bf16[32,256], index: 7, kind: input, shape index: {}]   ;;  %s748_s8 = inlined_call_operand.vmem [shape: f32[1,256], index: 8, kind: input, shape index: {}]   ;;  %s749_s9 = inlined_call_operand.hbm [shape: f32[2,256], index: 9, kind: output, shape index: {}]  }
   0x1   :  { %16 = vsyncpa [#allocation7], 0 }
   0x2   :  { %17 = vsyncpa [#allocation10], 0 }
   0x3   :  { %18 = vsyncpa [#allocation5], 0  ;;  %s576_s30 = smov [#allocation6]   ;;  %s577_s11 = smov [#allocation3]  }
   0x4   :  { %s41_s10 = sshll.u32 %s576_s30, 4  ;;  %s28_s12 = sshll.u32 %s577_s11, 4  ;;  %s42_s10 = int_to_ptr.vmem [resolvable:$true] %s41_s10  ;;  %s638_s12 = int_to_ptr.vmem [resolvable:$true] %s28_s12 }
   0x5   :  { %s458_s15 = scalar_lea.hbm %s743_s3, 16 }
   0x6   :  { %p459_p0 = scmp.ne.s32.totalorder %s743_s3, %s458_s15  ;;  %p462_p1 = scmp.lt.u32.totalorder %s458_s15, %s743_s3 }
   0x8   :  { %p464_p2 = pnand %p462_p1, %p459_p0 }
   0xa   :  { %467 = shalt.err (!%p464_p2)
}
   0xb   :  { %s468_s20 = scalar_lea.vmem %s42_s10, 16  ;;  %s472_s21 = scalar_lea.vmem %s42_s10, 32 }
   0xc   :  { %p469_p3 = scmp.ne.s32.totalorder %s42_s10, %s468_s20  ;;  %p473_p4 = scmp.lt.s32.totalorder %s42_s10, %s42_s10 }
   0xd   :  { %p474_p5 = scmp.lt.s32.totalorder %s472_s21, %s468_s20 }
   0xf   :  { %p475_p6 = por %p474_p5, %p473_p4 }
  0x11   :  { %p476_p7 = pnand %p475_p6, %p469_p3 }
  0x13   :  { %479 = shalt.err (!%p476_p7)
}
  0x14   :  { %44 = dma.hbm_to_vmem [thread:$0]  %s743_s3, 16, %s42_s10, [#allocation7]  }
  0x15   :  { %s480_s26 = scalar_lea.hbm %s742_s2, 256 }
  0x16   :  { %p481_p8 = scmp.ne.s32.totalorder %s742_s2, %s480_s26  ;;  %p484_p9 = scmp.lt.u32.totalorder %s480_s26, %s742_s2 }
  0x18   :  { %p486_p10 = pnand %p484_p9, %p481_p8 }
  0x1a   :  { %489 = shalt.err (!%p486_p10)
}
  0x1b   :  { %s490_s11 = scalar_lea.vmem %s638_s12, 256  ;;  %p495_p12 = scmp.lt.s32.totalorder %s638_s12, %s638_s12 }
  0x1c   :  { %p491_p11 = scmp.ne.s32.totalorder %s638_s12, %s490_s11  ;;  %p496_p13 = scmp.lt.s32.totalorder %s490_s11, %s490_s11 }
  0x1e   :  { %p497_p0 = por %p496_p13, %p495_p12 }
  0x20   :  { %p498_p1 = pnand %p497_p0, %p491_p11 }
  0x22   :  { %501 = shalt.err (!%p498_p1)
}
  0x23   :  { %s578_s3 = smov 64   ;;  %s579_s10 = smov 4  }
  0x24   :  { %34 = dma.hbm_to_vmem [thread:$0]  %s742_s2, 256, %s638_s12, [#allocation4], %s578_s3, %s578_s3, %s579_s10  }
  0x25   :  { %s580_s15 = smov [#allocation8]   ;;  %s581_s17 = smov [#allocation9]  }
  0x26   :  { %s51_s16 = sshll.u32 %s580_s15, 4  ;;  %s64_s18 = sshll.u32 %s581_s17, 4  ;;  %s52_s16 = int_to_ptr.vmem [resolvable:$true] %s51_s16  ;;  %s669_s18 = int_to_ptr.vmem [resolvable:$true] %s64_s18 }
  0x27   :  { %s502_s21 = scalar_lea.hbm %s744_s4, 16 }
  0x28   :  { %p503_p2 = scmp.ne.s32.totalorder %s744_s4, %s502_s21  ;;  %p506_p3 = scmp.lt.u32.totalorder %s502_s21, %s744_s4 }
  0x2a   :  { %p508_p4 = pnand %p506_p3, %p503_p2 }
  0x2c   :  { %511 = shalt.err (!%p508_p4)
}
  0x2d   :  { %s512_s2 = scalar_lea.vmem %s52_s16, 16  ;;  %s516_s12 = scalar_lea.vmem %s52_s16, 32 }
  0x2e   :  { %p513_p5 = scmp.ne.s32.totalorder %s52_s16, %s512_s2  ;;  %p517_p6 = scmp.lt.s32.totalorder %s52_s16, %s52_s16 }
  0x2f   :  { %p518_p7 = scmp.lt.s32.totalorder %s516_s12, %s512_s2 }
  0x31   :  { %p519_p8 = por %p518_p7, %p517_p6 }
  0x33   :  { %p520_p9 = pnand %p519_p8, %p513_p5 }
  0x35   :  { %523 = shalt.err (!%p520_p9)
}
  0x36   :  { %54 = dma.hbm_to_vmem [thread:$0]  %s744_s4, 16, %s52_s16, [#allocation7]  }
  0x37   :  { %s524_s30 = scalar_lea.hbm %s747_s7, 512 }
  0x38   :  { %p525_p10 = scmp.ne.s32.totalorder %s747_s7, %s524_s30  ;;  %p528_p11 = scmp.lt.u32.totalorder %s524_s30, %s747_s7 }
  0x3a   :  { %p530_p12 = pnand %p528_p11, %p525_p10 }
  0x3c   :  { %533 = shalt.err (!%p530_p12)
}
  0x3d   :  { %s534_s14 = scalar_lea.vmem %s669_s18, 512  ;;  %p539_p0 = scmp.lt.s32.totalorder %s669_s18, %s669_s18 }
  0x3e   :  { %p535_p13 = scmp.ne.s32.totalorder %s669_s18, %s534_s14  ;;  %p540_p1 = scmp.lt.s32.totalorder %s534_s14, %s534_s14 }
  0x40   :  { %p541_p2 = por %p540_p1, %p539_p0 }
  0x42   :  { %p542_p3 = pnand %p541_p2, %p535_p13 }
  0x44   :  { %545 = shalt.err (!%p542_p3)
}
  0x45   :  { %s582_s4 = smov 128   ;;  %s583_s15 = smov 8  }
  0x46   :  { %70 = dma.hbm_to_vmem [thread:$0]  %s747_s7, 512, %s669_s18, [#allocation10], %s582_s4, %s582_s4, %s583_s15  }
  0x47   :  { %568 = dma.done.wait [#allocation4], 256  }
  0x48   :  { %569 = vsyncadd [#allocation4], 4294967040 }
  0x49   :  { %570 = dma.done.wait [#allocation7], 32  }
  0x4a   :  { %571 = vsyncadd [#allocation7], 4294967264 }
  0x4b   :  { %572 = dma.done.wait [#allocation10], 512  }
  0x4c   :  { %573 = vsyncadd [#allocation10], 4294966784  ;;  %v584_v0 = vmov 0.0   ;;  %vm585_vm0 = vmmov 0   ;;  %v436_v1 = vld [vmem:[#allocation3] sm:$0xff]   ;;  %v437_v2 = vld [vmem:[#allocation3 + $0x8] sm:$0xff]   ;;  %p88_p4 = scmp.ne.f32.partialorder %s740_s0, %s740_s0  ;;  %v123_v7 = vlaneseq }
  0x4d   :  { %408 = vmatprep.subr.bf16.mxu0 %v584_v0  ;;  %412 = vmatprep.mubr.msk.bf16.mxu0 %vm585_vm0, %v584_v0  ;;  %v119_v3 = vld [vmem:[%s741_s1] sm:$0x3]  ;;  %vm139_vm1 = vcmask 261120   ;;  %v439_v6 = vld [vmem:[%s745_s5 + $0x8] sm:$0xff]   ;;  %s89_s1 = sshrl.u32 %s740_s0, 16  ;;  %v586_v33 = vmov 0  }
  0x4e   :  { %416 = vmatprep.subr.bf16.mxu1 %v584_v0  ;;  %420 = vmatprep.mubr.msk.bf16.mxu1 %vm585_vm0, %v584_v0  ;;  %v120_v4 = vpack.c.bf16 %v119_v3, %v119_v3  ;;  %v438_v5 = vld [vmem:[%s745_s5] sm:$0xff]   ;;  %s90_s25 = sand.u32 1, %s89_s1  ;;  %v116_v8 = vld [vmem:[#allocation6] sm:$0x1]  ;;  %v124_v10 = vshrl.u32 %v123_v7, 7 }
  0x4f   :  { %409 = vmatpush3.bf16.msra.mxu0 %v436_v1  ;;  %417 = vmatpush3.bf16.msra.mxu1 %v438_v5  ;;  %s91_s2 = sadd.s32 32767, %s90_s25  ;;  %v117_v9 = vunpack.c.l.bf16 %v116_v8  ;;  %v389_v15 = vld [vmem:[#allocation8] ss:$0 sm:$0xff]  ;;  %v442_v29 = vld [vmem:[#allocation9 + $0x4] ss:$8 sps:$4 sm:$0xff]  }
  0x50   :  { %410 = vmatprep.subr.bf16.mxu0 %v584_v0  ;;  %418 = vmatprep.subr.bf16.mxu1 %v584_v0  ;;  %s92_s27 = sadd.s32 %s91_s2, %s740_s0  ;;  %v125_v13 = vsub.s32 0, %v124_v10  ;;  %v440_v30 = vld [vmem:[#allocation9] ss:$8 sps:$4 sm:$0xff]   ;;  %v445_v31 = vld [vmem:[#allocation9 + $0x14] ss:$8 sps:$4 sm:$0xff]   ;;  %v286_v48 = vsub.s32 1, %v124_v10 }
  0x51   :  { %s93_s30 = sand.u32 4294901760, %s92_s27  ;;  %v443_v32 = vld [vmem:[#allocation9 + $0x10] ss:$8 sps:$4 sm:$0xff]   ;;  %v391_v34 = vld [vmem:[%s746_s6] ss:$0 sm:$0xff]  ;;  %s587_s6 = smov [#allocation11]  }
  0x52   :  { %s751_s30 = smov (%p88_p4, %s93_s30), 2143289344  ;;  %v277_v47 = vld [vmem:[%s748_s8] sm:$0x3]  ;;  %s374_s20 = sshll.u32 %s587_s6, 4  ;;  %s375_s20 = int_to_ptr.vmem [resolvable:$true] %s374_s20 }
  0x53   :  { %411 = vmatpush3.bf16.msra.mxu0 %v437_v2  ;;  %419 = vmatpush3.bf16.msra.mxu1 %v439_v6  ;;  %s96_s11 = sshrl.u32 %s751_s30, 16  ;;  %v283_v49 = vrot.slane %v277_v47, %v125_v13  ;;  %v287_v50 = vrot.slane %v277_v47, %v286_v48  ;;  %s546_s7 = scalar_lea.vmem %s375_s20, 64 }
  0x54   :  { %s97_s5 = sand.u32 32767, %s96_s11  ;;  %s98_s14 = sand.u32 32768, %s96_s11  ;;  %313 = vmatprep.subr.bf16.mxu0 %v442_v29 }
  0x55   :  { %s99_s3 = sshll.u32 %s97_s5, 16  ;;  %s109_s4 = sshll.u32 %s98_s14, 16 }
  0x56   :  { %413 = vmatmul.mubr.msk.bf16.vlgmr.msra.gmra.mrb[0].mxu0 %vm139_vm1, %v120_v4  ;;  %s102_s10 = sadd.s32 8388608, %s99_s3  ;;  %p101_p5 = scmp.lt.s32.totalorder %s99_s3, 8388608 }
  0x57   :  { %s385_s13 = sadd.f32 -1.1754944e-38, %s102_s10  ;;  %p100_p6 = scmp.ge.s32.totalorder %s99_s3, 2139095040  ;;  %314 = vmatpush1.bf16.msra.mxu0 %v440_v30  ;;  %345 = vmatprep.mubr.bf16.mxu0 %v586_v33 }
  0x58   :  { %315 = vmatprep.subr.bf16.mxu0 %v445_v31  ;;  %p547_p7 = scmp.ne.s32.totalorder %s375_s20, %s546_s7  ;;  %p551_p8 = scmp.lt.s32.totalorder %s375_s20, %s375_s20 }
  0x59   :  { %s753_s13 = smov (!%p101_p5, %s385_s13), %s99_s3  ;;  %p552_p9 = scmp.lt.s32.totalorder %s546_s7, %s546_s7 }
  0x5a   :  { %s755_s3 = smov (!%p100_p6, %s99_s3), %s753_s13 }
  0x5b   :  { %s110_s15 = sor.u32 %s109_s4, %s755_s3  ;;  %316 = vmatpush1.bf16.msra.mxu0 %v443_v32  ;;  %p553_p10 = por %p552_p9, %p551_p8 }
  0x5c   :  { %v121_v11 = vstv %s110_s15 }
  0x5d   :  { %v122_v12 = vmul.f32 %v121_v11, %v117_v9  ;;  %p554_p11 = pnand %p553_p10, %p547_p7 }
  0x5f   :  { %v126_v14 = vrot.slane %v122_v12, %v125_v13 }
 0x129   :  { %v177_v16 = vpop.f32.mrb[0].mxu0 }
 0x12a   :  { %v178_v17 = vadd.f32 %v177_v16, %v126_v14  ;;  %v414_v18 = vpop.f32.mrb[1].mxu0 }
 0x12b   :  { %v180_v19 = vpop.f32.mrb[2].mxu0 }
 0x12c   :  { %v189_v20 = vadd.f32 %v389_v15, %v178_v17  ;;  %v415_v21 = vpop.f32.mrb[3].mxu0 }
 0x12e   :  { %v390_v22 = vmul.f32 -1.442695, %v189_v20  ;;  %v190_v25 = vmul.f32 0.909, %v189_v20 }
 0x130   :  { %446 = vpow2.f32 %v390_v22 }
 0x13a   :  { %v447_v23 = vpop.eup %446 }
 0x13b   :  { %v194_v24 = vadd.f32 1.0, %v447_v23 }
 0x13d   :  { %448 = vrcp.f32 %v194_v24 }
 0x147   :  { %v449_v26 = vpop.eup %448 }
 0x148   :  { %v197_v27 = vmul.f32 %v449_v26, %v190_v25 }
 0x14a   :  { %v203_v28 = vpack.c.bf16 %v197_v27, %v197_v27 }
 0x14c   :  { %421 = vmatmul.mubr.msk.bf16.vlgmr.msra.gmra.mrb[0].mxu1 %vm139_vm1, %v203_v28 }
 0x21f   :  { %v259_v35 = vpop.f32.mrb[0].mxu1 }
 0x220   :  { %v260_v36 = vadd.f32 %v391_v34, %v259_v35  ;;  %v422_v37 = vpop.f32.mrb[1].mxu1 }
 0x221   :  { %v262_v38 = vpop.f32.mrb[2].mxu1 }
 0x222   :  { %v395_v39 = vmul.f32 -1.442695, %v260_v36  ;;  %v423_v40 = vpop.f32.mrb[3].mxu1  ;;  %v265_v43 = vmul.f32 0.909, %v260_v36 }
 0x224   :  { %450 = vpow2.f32 %v395_v39 }
 0x22e   :  { %v451_v41 = vpop.eup %450 }
 0x22f   :  { %v269_v42 = vadd.f32 1.0, %v451_v41 }
 0x231   :  { %452 = vrcp.f32 %v269_v42 }
 0x23b   :  { %v453_v44 = vpop.eup %452 }
 0x23c   :  { %v272_v45 = vmul.f32 %v453_v44, %v265_v43 }
 0x23e   :  { %v278_v46 = vpack.c.bf16 %v272_v45, %v272_v45 }
 0x240   :  { %400 = vmatmul.mubr.msk.bf16.vlgmr.msra.gmra.mrb[4].mxu0 %vm139_vm1, %v278_v46 }
 0x313   :  { %v347_v51 = vpop.f32.mrb[4].mxu0 }
 0x314   :  { %v348_v52 = vadd.f32 %v347_v51, %v283_v49  ;;  %v349_v53 = vpop.f32.mrb[5].mxu0 }
 0x315   :  { %v350_v54 = vadd.f32 %v349_v53, %v287_v50  ;;  %v351_v55 = vpop.f32.mrb[6].mxu0 }
 0x316   :  { %454 = vtanh.f32 %v348_v52  ;;  %v352_v56 = vpop.f32.mrb[7].mxu0 }
 0x317   :  { %456 = vtanh.f32 %v350_v54 }
 0x320   :  { %v455_v57 = vpop.eup %454 }
 0x321   :  { %v457_v58 = vpop.eup %456 }
 0x322   :  { %v358_v59 = vcombine.low %v455_v57, %v457_v58 }
 0x324   :  { %401 = vst.sshfl [vmem:[#allocation11] sm:$0x33 pattern:$0x76325410] %v358_v59 }
 0x325   :  { %557 = shalt.err (!%p554_p11)
}
 0x326   :  { %s558_s21 = scalar_lea.hbm %s749_s9, 64 }
 0x327   :  { %p559_p12 = scmp.ne.s32.totalorder %s749_s9, %s558_s21  ;;  %p562_p13 = scmp.lt.u32.totalorder %s558_s21, %s749_s9 }
 0x329   :  { %p564_p0 = pnand %p562_p13, %p559_p12 }
 0x32b   :  { %567 = shalt.err (!%p564_p0)
}
 0x32c   :  { %377 = dma.vmem_to_hbm [thread:$0]  %s375_s20, 64, %s749_s9, [#allocation5]  }
 0x32d   :  { %574 = dma.done.wait [#allocation5], 64  }
 0x32e   :  { %575 = vsyncadd [#allocation5], 4294967232 }
 0x32f   :  { %381 = vsyncpa [#allocation4], 1 }
 0x330   :  { %382 = vsyncpa [#allocation7], 1 }
 0x331   :  { %383 = vsyncpa [#allocation10], 1 }
 0x332   :  { %384 = vsyncpa [#allocation5], 1 }

</bundles_post_ra>
